<compile_context>
chip_gen: v5e
topology: v5e:2x2
jax: 0.10.0
libtpu: 0.0.40
codegen_flags: <defaults>
</compile_context>

<pallas_src>
import functools

import jax
import jax.numpy as jnp
from jax.experimental import pallas as pl
from jax.experimental.pallas import tpu as pltpu


def _stack_causal_shifts(v, lane_pos, kernel_size, dilation):
    """Stack K causally-shifted copies of v along the channel (sublane) axis.

    v:        (C, L) f32 — channels on sublanes, positions on lanes.
    lane_pos: (1, L) int32 lane iota.
    returns   (K*C, L) f32; row-block k is v shifted right by (K-1-k)*dilation,
              zero-filled in the causal pad region.
    """
    parts = []
    for k in range(kernel_size):
        s = (kernel_size - 1 - k) * dilation
        if s == 0:
            parts.append(v)
        else:
            rolled = pltpu.roll(v, shift=s, axis=1)          # XLU lane rotate
            parts.append(jnp.where(lane_pos >= s, rolled, 0.0))
    return jnp.concatenate(parts, axis=0)


def _casual_residual_kernel(x_ref, w1s_ref, b1_ref, w2_ref, bf_ref, o_ref, *,
                            kernel_size):
    C = o_ref.shape[1]
    L = o_ref.shape[2]
    x = x_ref[0].astype(jnp.float32)                          # (C, L)
    lane_pos = jax.lax.broadcasted_iota(jnp.int32, (1, L), 1)

    # Dilation-1 work: conv1 and the skip conv share shifted inputs -> one matmul.
    xs1 = _stack_causal_shifts(x, lane_pos, kernel_size, 1)   # (K*C, L)
    y = jnp.dot(w1s_ref[...], xs1,
                preferred_element_type=jnp.float32)           # (2C, L)
    h = jnp.maximum(y[:C] + b1_ref[...], 0.0)                 # relu_1
    skip = y[C:]                                              # skip conv (no bias yet)

    # conv2 (dilation 2) on the relu'd branch.
    xs2 = _stack_causal_shifts(h, lane_pos, kernel_size, 2)   # (K*C, L)
    h2 = jnp.dot(w2_ref[...], xs2,
                 preferred_element_type=jnp.float32)          # (C, L)

    out = jnp.maximum(h2 + skip + bf_ref[...], 0.0)           # relu_2 (b2+bs folded)
    o_ref[0] = out.astype(o_ref.dtype)


def casual_residual(x, params, kernel_size=3):
    """x: (B, C, L) float32 — same convention as the PyTorch module."""
    B, C, L = x.shape
    K = kernel_size

    def taps(w):  # (Cout, Cin, K) -> (Cout, K*Cin); column block k = w[:, :, k]
        return jnp.concatenate([w[:, :, k] for k in range(K)],
                               axis=1).astype(jnp.float32)

    w1s = jnp.concatenate([taps(params["w1"]), taps(params["ws"])], axis=0)  # (2C, K*C)
    w2 = taps(params["w2"])                                                  # (C,  K*C)
    b1 = params["b1"].reshape(C, 1).astype(jnp.float32)
    bf = (params["b2"] + params["bs"]).reshape(C, 1).astype(jnp.float32)

    # Explicit scoped-VMEM budget: double-buffered in/out tiles + weights +
    # in-kernel intermediates, with generous headroom, capped below v7x's 64 MiB.
    f32 = 4
    tile_bytes = C * L * f32
    weight_bytes = (w1s.size + w2.size + 2 * C) * f32
    est = (2 * K + 10) * tile_bytes + 2 * weight_bytes
    vmem_limit = int(min(64 * 1024 * 1024, max(8 * 1024 * 1024, 2 * est)))

    kern = functools.partial(_casual_residual_kernel, kernel_size=K)
    const = lambda b: (0, 0)
    return pl.pallas_call(
        kern,
        out_shape=jax.ShapeDtypeStruct((B, C, L), x.dtype),
        grid=(B,),
        in_specs=[
            pl.BlockSpec((1, C, L), lambda b: (b, 0, 0)),   # x: one sequence/step
            pl.BlockSpec((2 * C, K * C), const),            # merged conv1+skip weights
            pl.BlockSpec((C, 1), const),                    # b1
            pl.BlockSpec((C, K * C), const),                # conv2 weights
            pl.BlockSpec((C, 1), const),                    # b2 + bs
        ],
        out_specs=pl.BlockSpec((1, C, L), lambda b: (b, 0, 0)),
        compiler_params=pltpu.CompilerParams(
            dimension_semantics=("parallel",),
            vmem_limit_bytes=vmem_limit,
        ),
    )(x, w1s, b1, w2, bf)


# ----------------------- pure-JAX reference (for checking) -----------------------
def _ref_causal_conv1d(x, w, b, dilation):
    pad = (w.shape[-1] - 1) * dilation
    y = jax.lax.conv_general_dilated(
        x, w, window_strides=(1,), padding=[(pad, 0)],
        rhs_dilation=(dilation,),
        dimension_numbers=("NCH", "OIH", "NCH"))
    return y + b[None, :, None]


def _ref_forward(x, params):
    h = jax.nn.relu(_ref_causal_conv1d(x, params["w1"], params["b1"], 1))
    h = _ref_causal_conv1d(h, params["w2"], params["b2"], 2)
    skip = _ref_causal_conv1d(x, params["ws"], params["bs"], 1)
    return jax.nn.relu(h + skip)


if __name__ == "__main__":
    B, C, L, K = 2, 8, 128, 3   # inputs_shape = (B, C, L), kernel_size = 3
    key = jax.random.PRNGKey(0)
    kx, k1, k2, k3, k4, k5, k6 = jax.random.split(key, 7)
    bound = 1.0 / (C * K) ** 0.5   # PyTorch Conv1d default uniform bound
    params = {
        "w1": jax.random.uniform(k1, (C, C, K), jnp.float32, -bound, bound),
        "b1": jax.random.uniform(k2, (C,), jnp.float32, -bound, bound),
        "w2": jax.random.uniform(k3, (C, C, K), jnp.float32, -bound, bound),
        "b2": jax.random.uniform(k4, (C,), jnp.float32, -bound, bound),
        "ws": jax.random.uniform(k5, (C, C, K), jnp.float32, -bound, bound),
        "bs": jax.random.uniform(k6, (C,), jnp.float32, -bound, bound),
    }
    x = jax.random.normal(kx, (B, C, L), jnp.float32)

    out = jax.block_until_ready(casual_residual(x, params, kernel_size=K))
    ref = jax.block_until_ready(_ref_forward(x, params))
    assert out.shape == (B, C, L)
    err = float(jnp.max(jnp.abs(out - ref)))
    assert jnp.allclose(out, ref, atol=1e-5, rtol=1e-5), f"max abs err = {err}"
    print("KERNEL_OK")
</pallas_src>

<mosaic_0001>
module attributes {stable_mosaic.version = 11 : i64} {
  func.func @_casual_residual_kernel(%arg0: i32, %arg1: memref<1x8x128xf32, #tpu.memory_space<vmem>>, %arg2: memref<16x24xf32, #tpu.memory_space<vmem>>, %arg3: memref<8x1xf32, #tpu.memory_space<vmem>>, %arg4: memref<8x24xf32, #tpu.memory_space<vmem>>, %arg5: memref<8x1xf32, #tpu.memory_space<vmem>>, %arg6: memref<1x8x128xf32, #tpu.memory_space<vmem>>) attributes {dimension_semantics = [#tpu.dimension_semantics<parallel>], iteration_bounds = array<i64: 2>, scalar_prefetch = 0 : i64, scratch_operands = 0 : i64, tpu.core_type = #tpu.core_type<tc>, window_params = [{transform_indices = @transform_0, window_bounds = array<i64: 1, 8, 128>}, {pipeline_mode = #tpu.pipeline_mode<synchronous>, transform_indices = @transform_1, window_bounds = array<i64: 16, 24>}, {pipeline_mode = #tpu.pipeline_mode<synchronous>, transform_indices = @transform_2, window_bounds = array<i64: 8, 1>}, {pipeline_mode = #tpu.pipeline_mode<synchronous>, transform_indices = @transform_3, window_bounds = array<i64: 8, 24>}, {pipeline_mode = #tpu.pipeline_mode<synchronous>, transform_indices = @transform_4, window_bounds = array<i64: 8, 1>}, {transform_indices = @transform_5, window_bounds = array<i64: 1, 8, 128>}]} {
    %c0 = arith.constant 0 : index
    %c0_0 = arith.constant 0 : index
    %c0_1 = arith.constant 0 : index
    %0 = vector.load %arg1[%c0, %c0_0, %c0_1] : memref<1x8x128xf32, #tpu.memory_space<vmem>>, vector<1x8x128xf32>
    %1 = vector.shape_cast %0 : vector<1x8x128xf32> to vector<8x128xf32>
    %2 = tpu.iota {dimensions = array<i32: 1>} : vector<1x128xi32>
    %c2_i32 = arith.constant 2 : i32
    %3 = tpu.dynamic_rotate %1 by %c2_i32 dim 1 : vector<8x128xf32>, i32 -> vector<8x128xf32>
    %c2_i32_2 = arith.constant 2 : i32
    %4 = vector.broadcast %c2_i32_2 : i32 to vector<1x128xi32>
    %5 = arith.cmpi sge, %2, %4 : vector<1x128xi32>
    %cst = arith.constant 0.000000e+00 : f32
    %6 = vector.shape_cast %5 : vector<1x128xi1> to vector<1x128xi1>
    %7 = vector.broadcast %6 : vector<1x128xi1> to vector<8x128xi1>
    %8 = vector.broadcast %cst : f32 to vector<8x128xf32>
    %9 = arith.select %7, %3, %8 : vector<8x128xi1>, vector<8x128xf32>
    %c1_i32 = arith.constant 1 : i32
    %10 = tpu.dynamic_rotate %1 by %c1_i32 dim 1 : vector<8x128xf32>, i32 -> vector<8x128xf32>
    %c1_i32_3 = arith.constant 1 : i32
    %11 = vector.broadcast %c1_i32_3 : i32 to vector<1x128xi32>
    %12 = arith.cmpi sge, %2, %11 : vector<1x128xi32>
    %cst_4 = arith.constant 0.000000e+00 : f32
    %13 = vector.shape_cast %12 : vector<1x128xi1> to vector<1x128xi1>
    %14 = vector.broadcast %13 : vector<1x128xi1> to vector<8x128xi1>
    %15 = vector.broadcast %cst_4 : f32 to vector<8x128xf32>
    %16 = arith.select %14, %10, %15 : vector<8x128xi1>, vector<8x128xf32>
    %17 = tpu.concatenate %9, %16, %1 in 0 : vector<8x128xf32>, vector<8x128xf32>, vector<8x128xf32> -> vector<24x128xf32>
    %c0_5 = arith.constant 0 : index
    %c0_6 = arith.constant 0 : index
    %18 = vector.load %arg2[%c0_5, %c0_6] : memref<16x24xf32, #tpu.memory_space<vmem>>, vector<16x24xf32>
    %cst_7 = arith.constant dense<0.000000e+00> : vector<16x128xf32>
    %19 = tpu.matmul %18, %17, %cst_7 {dimension_numbers = #tpu.dot_dimension_numbers<[1], [0], [0], [1], [0, 0, 1, 1], [], []>} : vector<16x24xf32>, vector<24x128xf32>, vector<16x128xf32> -> vector<16x128xf32>
    %20 = vector.extract_strided_slice %19 {offsets = [0, 0], sizes = [8, 128], strides = [1, 1]} : vector<16x128xf32> to vector<8x128xf32>
    %c0_8 = arith.constant 0 : index
    %c0_9 = arith.constant 0 : index
    %21 = vector.load %arg3[%c0_8, %c0_9] : memref<8x1xf32, #tpu.memory_space<vmem>>, vector<8x1xf32>
    %22 = vector.broadcast %21 : vector<8x1xf32> to vector<8x128xf32>
    %23 = arith.addf %20, %22 : vector<8x128xf32>
    %cst_10 = arith.constant 0.000000e+00 : f32
    %24 = vector.broadcast %cst_10 : f32 to vector<8x128xf32>
    %25 = arith.maximumf %23, %24 : vector<8x128xf32>
    %26 = vector.extract_strided_slice %19 {offsets = [8, 0], sizes = [8, 128], strides = [1, 1]} : vector<16x128xf32> to vector<8x128xf32>
    %c4_i32 = arith.constant 4 : i32
    %27 = tpu.dynamic_rotate %25 by %c4_i32 dim 1 : vector<8x128xf32>, i32 -> vector<8x128xf32>
    %c4_i32_11 = arith.constant 4 : i32
    %28 = vector.broadcast %c4_i32_11 : i32 to vector<1x128xi32>
    %29 = arith.cmpi sge, %2, %28 : vector<1x128xi32>
    %cst_12 = arith.constant 0.000000e+00 : f32
    %30 = vector.shape_cast %29 : vector<1x128xi1> to vector<1x128xi1>
    %31 = vector.broadcast %30 : vector<1x128xi1> to vector<8x128xi1>
    %32 = vector.broadcast %cst_12 : f32 to vector<8x128xf32>
    %33 = arith.select %31, %27, %32 : vector<8x128xi1>, vector<8x128xf32>
    %c2_i32_13 = arith.constant 2 : i32
    %34 = tpu.dynamic_rotate %25 by %c2_i32_13 dim 1 : vector<8x128xf32>, i32 -> vector<8x128xf32>
    %c2_i32_14 = arith.constant 2 : i32
    %35 = vector.broadcast %c2_i32_14 : i32 to vector<1x128xi32>
    %36 = arith.cmpi sge, %2, %35 : vector<1x128xi32>
    %cst_15 = arith.constant 0.000000e+00 : f32
    %37 = vector.shape_cast %36 : vector<1x128xi1> to vector<1x128xi1>
    %38 = vector.broadcast %37 : vector<1x128xi1> to vector<8x128xi1>
    %39 = vector.broadcast %cst_15 : f32 to vector<8x128xf32>
    %40 = arith.select %38, %34, %39 : vector<8x128xi1>, vector<8x128xf32>
    %41 = tpu.concatenate %33, %40, %25 in 0 : vector<8x128xf32>, vector<8x128xf32>, vector<8x128xf32> -> vector<24x128xf32>
    %c0_16 = arith.constant 0 : index
    %c0_17 = arith.constant 0 : index
    %42 = vector.load %arg4[%c0_16, %c0_17] : memref<8x24xf32, #tpu.memory_space<vmem>>, vector<8x24xf32>
    %cst_18 = arith.constant dense<0.000000e+00> : vector<8x128xf32>
    %43 = tpu.matmul %42, %41, %cst_18 {dimension_numbers = #tpu.dot_dimension_numbers<[1], [0], [0], [1], [0, 0, 1, 1], [], []>} : vector<8x24xf32>, vector<24x128xf32>, vector<8x128xf32> -> vector<8x128xf32>
    %44 = arith.addf %43, %26 : vector<8x128xf32>
    %c0_19 = arith.constant 0 : index
    %c0_20 = arith.constant 0 : index
    %45 = vector.load %arg5[%c0_19, %c0_20] : memref<8x1xf32, #tpu.memory_space<vmem>>, vector<8x1xf32>
    %46 = vector.broadcast %45 : vector<8x1xf32> to vector<8x128xf32>
    %47 = arith.addf %44, %46 : vector<8x128xf32>
    %cst_21 = arith.constant 0.000000e+00 : f32
    %48 = vector.broadcast %cst_21 : f32 to vector<8x128xf32>
    %49 = arith.maximumf %47, %48 : vector<8x128xf32>
    %c0_22 = arith.constant 0 : index
    %c0_23 = arith.constant 0 : index
    %c0_24 = arith.constant 0 : index
    %50 = vector.load %arg6[%c0_22, %c0_23, %c0_24] : memref<1x8x128xf32, #tpu.memory_space<vmem>>, vector<1x8x128xf32>
    %51 = vector.shape_cast %50 : vector<1x8x128xf32> to vector<8x128xf32>
    %52 = vector.shape_cast %49 : vector<8x128xf32> to vector<1x8x128xf32>
    tpu.vector_store %arg6[%c0_22, %c0_23, %c0_24], %52 {strides = array<i32>} : memref<1x8x128xf32, #tpu.memory_space<vmem>>, vector<1x8x128xf32>,
    return
  }
  func.func @transform_0(%arg0: i32) -> (i32, i32, i32) {
    %c0_i32 = arith.constant 0 : i32
    %c0_i32_0 = arith.constant 0 : i32
    %c0_i32_1 = arith.constant 0 : i32
    return %arg0, %c0_i32, %c0_i32_0 : i32, i32, i32
  }
  func.func @transform_1(%arg0: i32) -> (i32, i32) {
    %c0_i32 = arith.constant 0 : i32
    %c0_i32_0 = arith.constant 0 : i32
    %c0_i32_1 = arith.constant 0 : i32
    return %c0_i32, %c0_i32_0 : i32, i32
  }
  func.func @transform_2(%arg0: i32) -> (i32, i32) {
    %c0_i32 = arith.constant 0 : i32
    %c0_i32_0 = arith.constant 0 : i32
    %c0_i32_1 = arith.constant 0 : i32
    return %c0_i32, %c0_i32_0 : i32, i32
  }
  func.func @transform_3(%arg0: i32) -> (i32, i32) {
    %c0_i32 = arith.constant 0 : i32
    %c0_i32_0 = arith.constant 0 : i32
    %c0_i32_1 = arith.constant 0 : i32
    return %c0_i32, %c0_i32_0 : i32, i32
  }
  func.func @transform_4(%arg0: i32) -> (i32, i32) {
    %c0_i32 = arith.constant 0 : i32
    %c0_i32_0 = arith.constant 0 : i32
    %c0_i32_1 = arith.constant 0 : i32
    return %c0_i32, %c0_i32_0 : i32, i32
  }
  func.func @transform_5(%arg0: i32) -> (i32, i32, i32) {
    %c0_i32 = arith.constant 0 : i32
    %c0_i32_0 = arith.constant 0 : i32
    %c0_i32_1 = arith.constant 0 : i32
    return %arg0, %c0_i32, %c0_i32_0 : i32, i32, i32
  }
}

</mosaic_0001>

<bundles_post_ra>
// kernel: tpu_custom_call.1
= control target key start
LH: loop header
LB: loop body
LE: loop exit
PB: predicated region body
PF: predicated region fallthrough
CT: control target
= control target key end

     0   :  { %10 = vsyncpa [#allocation3], 0  ;;  %s831_s0 = inlined_call_operand.vmem [shape: f32[2,8,128], index: 0, kind: input, shape index: {}]   ;;  %s832_s1 = inlined_call_operand.hbm [shape: f32[16,24], index: 1, kind: input, shape index: {}]   ;;  %s833_s2 = inlined_call_operand.vmem [shape: f32[8,1], index: 2, kind: input, shape index: {}]   ;;  %s834_s3 = inlined_call_operand.hbm [shape: f32[8,24], index: 3, kind: input, shape index: {}]   ;;  %s835_s4 = inlined_call_operand.vmem [shape: f32[8,1], index: 4, kind: input, shape index: {}]   ;;  %s836_s5 = inlined_call_operand.hbm [shape: f32[2,8,128], index: 5, kind: output, shape index: {}]  }
   0x1   :  { %11 = vsyncpa [#allocation6], 0 }
   0x2   :  { %12 = vsyncpa [#allocation4], 0 }
   0x3   :  { %14 = vsyncpa [#allocation4 + $0x1], 0  ;;  %s709_s18 = smov 0   ;;  %s711_s19 = smov 0  }
   0x4   :  { %s713_s20 = smov 0   ;;  %s715_s21 = smov 0  }
   0x5 LB: > { %s730_s22 = sadd.s32 4294967295, %s669_s21   ;;  %s446_s23 = sadd.s32 4294967294, %s669_s21   ;;  %s669_s21 = sphi %s715_s21, %s843_s21   ;;  %s665_s20 = sphi %s713_s20, %s842_s20   ;;  %s661_s19 = sphi %s711_s19, %s841_s19   ;;  %s657_s18 = sphi %s709_s18, %s840_s18  }
   0x6   : > { %s734_s24 = sadd.s32 1, %s669_s21   ;;  %s137_s25 = sadd.s32 1, %s665_s20 }
   0x7   : > { %s134_s26 = ssub.s32 %s669_s21, %s734_s24  ;;  %p147_p0 = scmp.ne.s32.totalorder %s665_s20, %s661_s19 }
   0x8   : > { %p135_p1 = scmp.eq.s32.totalorder %s134_s26, 0  ;;  %p148_p2 = scmp.eq.s32.totalorder %s730_s22, 1 }
   0x9   : > { %p153_p3 = scmp.ne.s32.totalorder %s661_s19, %s657_s18  ;;  %p154_p4 = scmp.eq.s32.totalorder %s446_s23, 1 }
   0xa   : > { %s745_s27 = scalar_select %p135_p1, %s665_s20, %s137_s25  }
   0xb   : > { %p747_p5 = por %p148_p2, %p147_p0  ;;  %p751_p6 = por %p154_p4, %p153_p3 }
   0xc   : > { %p447_p7 = scmp.ge.s32.totalorder %s669_s21, 1  ;;  %p161_p8 = scmp.lt.s32.totalorder %s669_s21, 3 }
   0xd   : > { %p491_p9 = scmp.eq.s32.totalorder %s730_s22, 0  ;;  %s172_s8 = sshll.u32 %s832_s1, 4  ;;  %s173_s8 = int_to_ptr.hbm [resolvable:$true] %s172_s8 }
   0xe   : > { %p758_p10 = pnand %p447_p7, %p161_p8  ;;  %s671_s9 = smov [#allocation2]  }
   0xf   : > { %s174_s10 = sshll.u32 %s671_s9, 4  ;;  %s190_s13 = sshll.u32 %s834_s3, 4  ;;  %s175_s10 = int_to_ptr.vmem [resolvable:$true] %s174_s10  ;;  %s191_s13 = int_to_ptr.hbm [resolvable:$true] %s190_s13 }
  0x10   : > { %p480_p11 = pneg %p758_p10  ;;  %s672_s14 = smov 128  }
  0x11   : > { %s673_s15 = smov 8   ;;  %s674_s16 = smov [#allocation5]  }
  0x12   : > { %p481_p12 = pnand %p491_p9, %p480_p11  ;;  %s192_s17 = sshll.u32 %s674_s16, 4  ;;  %s193_s17 = int_to_ptr.vmem [resolvable:$true] %s192_s17 }
  0x13   : > { %215 = sbr.rel (%p758_p10) target bundleno = 541 (0x21d), region = 40 }
  0x14   : > { %483 = dma.hbm_to_vmem [thread:$0]  (!%p481_p12), %s173_s8, 256, %s175_s10, [#allocation3], %s672_s14, %s672_s14, %s673_s15  }
  0x15   : > { %486 = dma.hbm_to_vmem [thread:$0]  (!%p481_p12), %s191_s13, 128, %s193_s17, [#allocation6]  }
  0x18   : > { %644 = dma.done.wait (%p491_p9), [#allocation3], 256  }
  0x19   : > { %646 = vsyncadd (%p491_p9), [#allocation3], 4294967040 }
  0x1a   : > { %648 = dma.done.wait (%p491_p9), [#allocation6], 128  }
  0x1b   : > { %650 = vsyncadd (%p491_p9), [#allocation6], 4294967168  ;;  %p248_p13 = scmp.lt.s32.totalorder %s730_s22, 1  ;;  %s675_s7 = smov 1   ;;  %v299_v1 = vld [vmem:[%s833_s2] sm:$0xff]  ;;  %v677_v2 = vmov 0   ;;  %v253_v3 = vlaneseq }
  0x1c   : > { %s676_s8 = smov 2   ;;  %536 = vset.pattern.permute.xlu1 %v677_v2  ;;  %537 = vset.pattern.permute.xlu2 %v677_v2  ;;  %v267_v6 = vld [vmem:[#allocation2] sm:$0xff]  ;;  %vm269_vm2 = vcmask 195584   ;;  %s678_s11 = smov 4   ;;  %v268_v12 = vld [vmem:[#allocation2 + $0x8] sm:$0xff]  ;;  %v316_v15 = vld [vmem:[#allocation5] sm:$0xff] }
  0x1d   : > { %s249_s23 = scalar_select %p248_p13, %s730_s22, 1  ;;  %302 = vperm.xlu1 %536, %v299_v1   ;;  %538 = vset.pattern.permute.xlu0 %v677_v2  ;;  %v254_v4 = vand.u32 127, %v253_v3  ;;  %v340_v13 = vld [vmem:[%s835_s4] sm:$0xff] }
  0x1e   : > { %s245_s14 = sand.u32 1, %s661_s19   ;;  %s464_s16 = sshll.u32 %s730_s22, 3 }
  0x1f   : > { %s455_s25 = sshll.u32 %s249_s23, 3  ;;  %vm263_vm0 = vcmp.ge.s32.totalorder %v254_v4, 1  ;;  %vm257_vm1 = vcmp.ge.s32.totalorder %v254_v4, 2  ;;  %vm309_vm3 = vcmp.ge.s32.totalorder %v254_v4, 4  ;;  %s454_s15 = sshll.u32 %s245_s14, 3 }
  0x20   : > { %s251_s6 = scalar_lea.vmem %s831_s0, %s455_s25  ;;  %s360_s25 = scalar_lea.hbm %s836_s5, %s464_s16 }
  0x21   : > { %v252_v0 = vld [vmem:[%s251_s6] sm:$0xff]  ;;  %s247_s26 = scalar_lea.vmem [#allocation7], %s454_s15  ;;  %s364_s6 = sshll.u32 %s360_s25, 4  ;;  %s365_s6 = int_to_ptr.hbm [resolvable:$true] %s364_s6 }
  0x22   : > { %261 = vrot.lane.b32.xlu0 %v252_v0, %s675_s7  ;;  %289 = vmatpush.msra.mxu0 %v252_v0  ;;  %s362_s30 = sshll.u32 %s247_s26, 4  ;;  %s350_s7 = scalar_lea.sflag [#allocation4], %s245_s14  ;;  %s363_s30 = int_to_ptr.vmem [resolvable:$true] %s362_s30 }
  0x23   : > { %467 = vmatpush.msra.mxu2 %v252_v0 }
  0x2a   : > { %255 = vrot.lane.b32.xlu0 %v252_v0, %s676_s8 }
  0x8f   : > { %v303_v8 = vpop.permute.xlu1 %302 }
  0x94   : > { %v262_v5 = vpop.permute.xlu0 %261 }
  0x95   : > { %456 = vmatpush.msk.msra.mxu0 %vm263_vm0, %v262_v5  ;;  %468 = vmatpush.msk.msra.mxu2 %vm263_vm0, %v262_v5 }
  0x9c   : > { %v256_v7 = vpop.permute.xlu0 %255 }
  0x9d   : > { %457 = vmatpush.msk.msra.mxu0 %vm257_vm1, %v256_v7  ;;  %469 = vmatpush.msk.msra.mxu2 %vm257_vm1, %v256_v7 }
  0x9e   : > { %458 = vmatmul.msk.f32.vlgmr.msra.gmra.mxu0 %vm269_vm2, %v267_v6  ;;  %459 = vmatmul.msk.f32.vlgmr.msra.gmra.mxu2 %vm269_vm2, %v268_v12 }
 0x11b   : > { %v293_v9 = vpop.f32.mrf.mxu0 }
 0x11c   : > { %v305_v10 = vadd.f32 %v303_v8, %v293_v9 }
 0x11e   : > { %v306_v11 = vmax.f32 %v305_v10, 0.0 }
 0x120   : > { %307 = vrot.lane.b32.xlu2 %v306_v11, %s678_s11  ;;  %313 = vrot.lane.b32.xlu1 %v306_v11, %s676_s8  ;;  %s613_s8 = sshra.s32 %s365_s6, 4  ;;  %s619_s11 = scalar_lea.hbm %s836_s5, 16  ;;  %s614_s8 = int_to_ptr.hbm [resolvable:$true] %s613_s8 }
 0x121   : > { %333 = vmatpush.msra.mxu1 %v306_v11  ;;  %v296_v17 = vpop.f32.mrf.mxu2  ;;  %s615_s22 = scalar_lea.hbm %s614_s8, 8  ;;  %p620_p3 = scmp.lt.s32.totalorder %s614_s8, %s836_s5 }
 0x122   : > { %p616_p0 = scmp.ne.s32.totalorder %s614_s8, %s615_s22  ;;  %p621_p4 = scmp.lt.s32.totalorder %s619_s11, %s615_s22 }
 0x124   : > { %p617_p1 = pnand %p616_p0, %p747_p5  ;;  %p622_p7 = por %p621_p4, %p620_p3 }
 0x126   : > { %p618_p2 = pneg %p617_p1 }
 0x128   : > { %343 = vperm.xlu2 %537, %v340_v13   ;;  %p623_p8 = pnand %p622_p7, %p618_p2 }
 0x17a   : > { %v308_v16 = vpop.permute.xlu2 %307 }
 0x182   : > { %v344_v19 = vpop.permute.xlu2 %343 }
 0x192   : > { %v314_v14 = vpop.permute.xlu1 %313 }
 0x193   : > { %460 = vmatpush.msk.msra.mxu1 %vm257_vm1, %v314_v14 }
 0x195   : > { %461 = vmatpush.msk.msra.mxu1 %vm309_vm3, %v308_v16 }
 0x196   : > { %462 = vmatmul.msk.f32.vlgmr.msra.gmra.mxu1 %vm269_vm2, %v316_v15 }
 0x213   : > { %v337_v18 = vpop.f32.mrf.mxu1 }
 0x214   : > { %v338_v20 = vadd.f32 %v337_v18, %v296_v17 }
 0x216   : > { %v346_v21 = vadd.f32 %v344_v19, %v338_v20 }
 0x218   : > { %v347_v22 = vmax.f32 %v346_v21, 0.0 }
 0x21a   : > { %348 = vst [vmem:[%s247_s26] sm:$0xff] %v347_v22 }
 0x21b   : > { %626 = shalt.err (!%p623_p8)
}
 0x21c   : > { %478 = dma.vmem_to_hbm [thread:$0]  (%p747_p5), %s363_s30, 128, %s365_s6, %s350_s7  }
 0x21d PF: > { %p495_p9 = scmp.ge.s32.totalorder %s669_s21, 2  ;;  %s376_s14 = sand.u32 1, %s657_s18  }
 0x21e   : > { %s377_s15 = scalar_lea.sflag [#allocation4], %s376_s14 }
 0x21f   : > { %p488_p10 = pnand %p495_p9, %p751_p6 }
 0x221   : > { %p489_p11 = pneg %p488_p10 }
 0x223   : > { %652 = dma.done.wait (%p489_p11), %s377_s15, 128  }
 0x224   : > { %654 = vsyncadd (%p489_p11), %s377_s15, 4294967168  ;;  %p17_p12 = scmp.ge.s32.totalorder %s734_s24, 4   ;;  %s840_s18 = smov %s661_s19 }
 0x225   : > { %s841_s19 = smov %s665_s20  ;;  %s842_s20 = smov %s745_s27 }
 0x226   : > { %s843_s21 = smov %s734_s24  ;;  %19 = sbr.rel (!%p17_p12) target bundleno = 5 (0x5), region = 84 }
 0x22b   :  { %383 = vsyncpa [#allocation3], 1 }
 0x22c   :  { %385 = vsyncpa [#allocation3 + $0x1], 1 }
 0x22d   :  { %386 = vsyncpa [#allocation6], 1 }
 0x22e   :  { %387 = vsyncpa [#allocation4], 1 }
 0x22f   :  { %389 = vsyncpa [#allocation4 + $0x1], 1 }

</bundles_post_ra>
